<compile_context>
chip_gen: v7x
topology: tpu7x:2x2x1
jax: 0.10.0
libtpu: 0.0.40
codegen_flags: <defaults>
</compile_context>

<pallas_src>
import jax
import jax.numpy as jnp
import numpy as np
from jax.experimental import pallas as pl
from jax.experimental.pallas import tpu as pltpu

# ---- model sizes (small, consistent with an image-flow forward pass) ----
B, C, H, W = 2, 4, 8, 8
HW = H * W
N = B * HW          # 128 rows -> lanes inside the kernel
HID = 16            # hidden width of the coupling param nets (1x1-conv MLP)
NUM_FLOWS = 2       # coupling layers per level
NUM_LEVELS = 2

assert N == 128, "kernel layout assumes B*H*W == 128 lanes"
assert B == 2, "mask/one-hot slab band is laid out for B == 2"

LOG2PI = float(np.log(2.0 * np.pi))

# ---- packed-parameter slab layout (all band offsets 8-aligned) ----
# per coupling (half-size h):
#   [0          : h*HID     )  w1 columns, each (HID,) broadcast across 128 lanes
#   [h*HID      : h*HID+HID )  b1 broadcast across lanes
#   [h*HID+HID  : +8        )  b2 broadcast across lanes (2h rows used)
#   [h*HID+HID+8: +8        )  w2^T  (2h rows x HID lanes used)
ROW_L1_0 = 0        # level-1 coupling j=0  (h=2, 64 rows)
ROW_L1_1 = 64       # level-1 coupling j=1  (h=2, 64 rows)
ROW_L0_0 = 128      # level-0 coupling j=0  (h=1, 48 rows)
ROW_L0_1 = 176      # level-0 coupling j=1  (h=1, 48 rows)
ROW_G = 224         # 8 rows: loc1^T(2) | inv_s1^T(2) | loc0^T(2) | inv_s0^T(2)
ROW_M = 232         # 8 rows: glp_const(1) | mask_b(2) | onehot_b(2)
SLAB_ROWS = 240


# ---------------------------------------------------------------------------
# in-kernel helper (traced inside the Pallas kernel body)
# ---------------------------------------------------------------------------
def _coupling_inverse(slab_ref, base, h, z_cond, z_tr):
    """Inverse affine coupling in the transposed (channels, lanes) layout.

    Forward:  z_tr' = z_tr * exp(s) + t,  (t, s) = net(z_cond)
    Inverse:  z_tr  = (z_tr' - t) * exp(-s), per-row log-det = -sum_c s
    z_cond: (h, N), z_tr: (h, N).  Returns (z_new (h, N), log_det_row (1, N)).
    """
    b1_off = base + h * HID
    b2_off = b1_off + HID
    w2_off = b2_off + 8

    # first layer: rank-h accumulation on the VPU; w1 columns & b1 are already
    # lane-broadcast in the slab, so this is pure vreg mul/add (K<=2 would be a
    # degenerate MXU matmul otherwise).
    hid = slab_ref[b1_off:b1_off + HID, :]                       # (HID, N)
    for k in range(h):
        w1k = slab_ref[base + k * HID:base + (k + 1) * HID, :]   # (HID, N), pre-bcast
        hid = hid + w1k * z_cond[k:k + 1, :]
    hid = jnp.maximum(hid, 0.0)

    # second layer: tiny (2h, HID) x (HID, N) dot.  bf16 inputs, f32 accumulation
    # (avoids the multi-pass f32 MXU decomposition on this serial critical path;
    # 2e-3 tolerance comfortably absorbs bf16 weights/activations here).
    w2T = slab_ref[w2_off:w2_off + 2 * h, 0:HID]                 # (2h, HID)
    out = jnp.dot(w2T.astype(jnp.bfloat16), hid.astype(jnp.bfloat16),
                  preferred_element_type=jnp.float32)            # (2h, N)
    out = out + slab_ref[b2_off:b2_off + 2 * h, :]               # b2 pre-bcast

    t = out[0:h, :]
    s = out[h:2 * h, :]
    z_new = (z_tr - t) * jnp.exp(-s)
    if h == 1:
        ld = -s                                                  # (1, N)
    else:
        ld = -(s[0:1, :] + s[1:2, :])                            # explicit row add, no XLU reduce
    return z_new, ld


# ---------------------------------------------------------------------------
# Pallas kernel: full log_prob (inverse flows + merge split + base log-probs)
# ---------------------------------------------------------------------------
def _nll_kernel(x_ref, slab_ref, out_ref):
    x = x_ref[...]                       # (C, N) = (4, 128), channels on sublanes
    zA = x[0:2, :]                       # first channel half  (2, N)
    zB = x[2:4, :]                       # second channel half (2, N)

    # ---- level 1 (top level): invert its flows in reverse order ----
    # j=1 (swap=True): conditioner = second half, transform first half
    zA, ld1 = _coupling_inverse(slab_ref, ROW_L1_1, 2, zB, zA)
    # j=0 (swap=False): conditioner = first half, transform second half
    zB, ld0 = _coupling_inverse(slab_ref, ROW_L1_0, 2, zA, zB)
    acc = ld1 + ld0                      # per-row log_q, (1, N)

    # ---- merges[0].inverse: split = (zA, zB); q0[1].log_prob on the split half ----
    gband = slab_ref[ROW_G:ROW_G + 8, :]
    loc1, is1 = gband[0:2, :], gband[2:4, :]
    d = (zB - loc1) * is1
    acc = acc - 0.5 * (d[0:1, :] * d[0:1, :] + d[1:2, :] * d[1:2, :])

    # ---- level 0: invert its flows on zA (2 channels -> halves of 1) ----
    za = zA[0:1, :]
    zb = zA[1:2, :]
    za, ld1 = _coupling_inverse(slab_ref, ROW_L0_1, 1, zb, za)   # j=1 swap=True
    zb, ld0 = _coupling_inverse(slab_ref, ROW_L0_0, 1, za, zb)   # j=0 swap=False
    acc = acc + ld1 + ld0

    # ---- q0[0].log_prob on the remaining channels ----
    loc0, is0 = gband[4:6, :], gband[6:8, :]
    da = (za - loc0[0:1, :]) * is0[0:1, :]
    db = (zb - loc0[1:2, :]) * is0[1:2, :]
    acc = acc - 0.5 * (da * da + db * db)

    # ---- fold the data-independent Gaussian term (per-lane row from the slab) ----
    mband = slab_ref[ROW_M:ROW_M + 8, :]
    acc = acc + mband[0:1, :]

    # ---- per-batch reduction: masked full-128-lane reductions, lane-dense store ----
    # forward(x) = -log_prob(x); lane b of the (1, 128) output holds NLL of batch b.
    s0 = jnp.sum(acc * mband[1:2, :], axis=1, keepdims=True)     # (1, 1)
    s1 = jnp.sum(acc * mband[2:3, :], axis=1, keepdims=True)     # (1, 1)
    out_ref[...] = -(s0 * mband[3:4, :] + s1 * mband[4:5, :])


# ---------------------------------------------------------------------------
# parameter init (deterministic, synthetic)
# ---------------------------------------------------------------------------
def init_params(key):
    keys = jax.random.split(key, 20)
    ki = iter(keys)

    def w(k, shape, scale=0.1):
        return (scale * jax.random.normal(k, shape)).astype(jnp.float32)

    params = {}
    # level 1 couplings: 2 in-channels -> HID -> 4 (= 2*t + 2*s)
    for j in range(NUM_FLOWS):
        params[f"l1_{j}"] = (w(next(ki), (2, HID)), w(next(ki), (1, HID)),
                             w(next(ki), (HID, 4)), w(next(ki), (1, 4)))
    # level 0 couplings: 1 in-channel -> HID -> 2 (= t + s)
    for j in range(NUM_FLOWS):
        params[f"l0_{j}"] = (w(next(ki), (1, HID)), w(next(ki), (1, HID)),
                             w(next(ki), (HID, 2)), w(next(ki), (1, 2)))
    # base distributions (DiagGaussian: per-element loc / log_scale over (H, W, C/2))
    params["loc1"] = w(next(ki), (HW, 2))
    params["ls1"] = w(next(ki), (HW, 2))
    params["loc0"] = w(next(ki), (HW, 2))
    params["ls0"] = w(next(ki), (HW, 2))
    return params


# ---------------------------------------------------------------------------
# one-time packing of parameters into a single lane-padded, pre-broadcast slab
# ---------------------------------------------------------------------------
def pack_params(params):
    slab = np.zeros((SLAB_ROWS, 128), np.float32)

    def put_coupling(base, h, w1, b1, w2, b2):
        w1 = np.asarray(w1); b1 = np.asarray(b1)
        w2 = np.asarray(w2); b2 = np.asarray(b2)
        for k in range(h):                                    # w1 columns, lane-broadcast
            slab[base + k * HID:base + (k + 1) * HID, :] = w1[k][:, None]
        slab[base + h * HID:base + h * HID + HID, :] = b1[0][:, None]   # b1, lane-broadcast
        b2_off = base + h * HID + HID
        slab[b2_off:b2_off + 2 * h, :] = b2[0][:, None]                  # b2, lane-broadcast
        w2_off = b2_off + 8
        slab[w2_off:w2_off + 2 * h, 0:HID] = w2.T                        # w2^T compact

    put_coupling(ROW_L1_0, 2, *params["l1_0"])
    put_coupling(ROW_L1_1, 2, *params["l1_1"])
    put_coupling(ROW_L0_0, 1, *params["l0_0"])
    put_coupling(ROW_L0_1, 1, *params["l0_1"])

    # Gaussian params, transposed to (C/2, B*HW); lane index = b*HW + hw (batch-major)
    # NOTE: tiling xB assumes identical Gaussian params per batch element (class_cond=False).
    loc1 = np.asarray(params["loc1"]); ls1 = np.asarray(params["ls1"])
    loc0 = np.asarray(params["loc0"]); ls0 = np.asarray(params["ls0"])
    slab[ROW_G + 0:ROW_G + 2, :] = np.tile(loc1.T, (1, B))
    slab[ROW_G + 2:ROW_G + 4, :] = np.tile(np.exp(-ls1).T, (1, B))
    slab[ROW_G + 4:ROW_G + 6, :] = np.tile(loc0.T, (1, B))
    slab[ROW_G + 6:ROW_G + 8, :] = np.tile(np.exp(-ls0).T, (1, B))

    # per-lane data-independent Gaussian term: sum over all C latent channels of
    # (-0.5*log(2*pi) - log_scale) at that spatial position
    glp = (-0.5 * LOG2PI * C) - ls1.sum(axis=1) - ls0.sum(axis=1)        # (HW,)
    slab[ROW_M, :] = np.tile(glp, B)

    # per-batch segment masks and output one-hots (epilogue reductions / placement)
    for b in range(B):
        slab[ROW_M + 1 + b, b * HW:(b + 1) * HW] = 1.0
        slab[ROW_M + 1 + B + b, b] = 1.0

    return jnp.asarray(slab)


# ---------------------------------------------------------------------------
# wrapper: MultiscaleFlow.forward(x) == -log_prob(x)
# ---------------------------------------------------------------------------
@jax.jit
def multiscale_flow_forward(x_nchw, slab):
    # NCHW -> (C, B*H*W): channels on sublanes, rows (batch-major) on lanes.
    # (2 KiB here; at realistic sizes have the producer emit channel-major instead.)
    x_cn = jnp.transpose(x_nchw, (1, 0, 2, 3)).reshape(C, N)

    out = pl.pallas_call(
        _nll_kernel,
        out_shape=jax.ShapeDtypeStruct((1, 128), jnp.float32),
        in_specs=[
            pl.BlockSpec(memory_space=pltpu.MemorySpace.VMEM),   # x (4, 128)
            pl.BlockSpec(memory_space=pltpu.MemorySpace.VMEM),   # packed param slab
        ],
        out_specs=pl.BlockSpec(memory_space=pltpu.MemorySpace.VMEM),
        compiler_params=pltpu.CompilerParams(vmem_limit_bytes=8 * 1024 * 1024),
    )(x_cn, slab)
    return out[0, :B]                     # first B lanes valid


# ---------------------------------------------------------------------------
# pure-JAX reference (same math, plain XLA) for correctness checking
# ---------------------------------------------------------------------------
def _forward_reference(x_nchw, params):
    x = jnp.transpose(x_nchw, (0, 2, 3, 1)).reshape(B, HW, C).astype(jnp.float32)

    def dense(a, w, b):
        if a.shape[-1] == 1:
            return a * w[0:1, :] + b
        return jnp.dot(a, w, precision=jax.lax.Precision.HIGHEST) + b

    def coupling_inv(z, w1, b1, w2, b2, swap):
        c = z.shape[-1]
        h = c // 2
        z1 = z[..., h:] if swap else z[..., :h]
        z2 = z[..., :h] if swap else z[..., h:]
        hid = jnp.maximum(dense(z1, w1, b1), 0.0)
        out = dense(hid, w2, b2)
        t, s = out[..., :h], out[..., h:]
        z2n = (z2 - t) * jnp.exp(-s)
        zn = jnp.concatenate([z2n, z1] if swap else [z1, z2n], axis=-1)
        return zn, -jnp.sum(s, axis=(1, 2))

    def gauss_lp(z, loc, ls):
        d = (z - loc[None]) * jnp.exp(-ls[None])
        lp = -0.5 * LOG2PI - ls[None] - 0.5 * d * d
        return jnp.sum(lp, axis=(1, 2))

    log_q = jnp.zeros((B,), jnp.float32)
    z = x
    for j in range(NUM_FLOWS - 1, -1, -1):
        z, ld = coupling_inv(z, *params[f"l1_{j}"], swap=(j % 2 == 1))
        log_q = log_q + ld
    z_keep, z_split = z[..., : C // 2], z[..., C // 2:]
    log_q = log_q + gauss_lp(z_split, params["loc1"], params["ls1"])
    z = z_keep
    for j in range(NUM_FLOWS - 1, -1, -1):
        z, ld = coupling_inv(z, *params[f"l0_{j}"], swap=(j % 2 == 1))
        log_q = log_q + ld
    log_q = log_q + gauss_lp(z, params["loc0"], params["ls0"])
    return -log_q


if __name__ == "__main__":
    key = jax.random.PRNGKey(0)
    kx, kp = jax.random.split(key)
    x = jax.random.normal(kx, (B, C, H, W), dtype=jnp.float32)   # NCHW, like PyTorch
    params = init_params(kp)

    slab = pack_params(params)            # done once, outside the hot path
    nll = multiscale_flow_forward(x, slab)
    nll = jax.block_until_ready(nll)

    ref = _forward_reference(x, params)
    assert nll.shape == (B,)
    np.testing.assert_allclose(np.asarray(nll), np.asarray(ref), rtol=2e-3, atol=2e-3)
    print("KERNEL_OK")
</pallas_src>

<mosaic_0001>
module attributes {stable_mosaic.version = 11 : i64} {
  func.func @_nll_kernel(%arg0: memref<4x128xf32, #tpu.memory_space<vmem>>, %arg1: memref<240x128xf32, #tpu.memory_space<vmem>>, %arg2: memref<1x128xf32, #tpu.memory_space<vmem>>) attributes {dimension_semantics = [], scalar_prefetch = 0 : i64, scratch_operands = 0 : i64, tpu.core_type = #tpu.core_type<tc>} {
    %c0 = arith.constant 0 : index
    %c0_0 = arith.constant 0 : index
    %0 = vector.load %arg0[%c0, %c0_0] : memref<4x128xf32, #tpu.memory_space<vmem>>, vector<4x128xf32>
    %1 = vector.extract_strided_slice %0 {offsets = [0, 0], sizes = [2, 128], strides = [1, 1]} : vector<4x128xf32> to vector<2x128xf32>
    %2 = vector.extract_strided_slice %0 {offsets = [2, 0], sizes = [2, 128], strides = [1, 1]} : vector<4x128xf32> to vector<2x128xf32>
    %c96 = arith.constant 96 : index
    %c0_1 = arith.constant 0 : index
    %3 = vector.load %arg1[%c96, %c0_1] : memref<240x128xf32, #tpu.memory_space<vmem>>, vector<16x128xf32>
    %c64 = arith.constant 64 : index
    %c0_2 = arith.constant 0 : index
    %4 = vector.load %arg1[%c64, %c0_2] : memref<240x128xf32, #tpu.memory_space<vmem>>, vector<16x128xf32>
    %5 = vector.extract_strided_slice %2 {offsets = [0, 0], sizes = [1, 128], strides = [1, 1]} : vector<2x128xf32> to vector<1x128xf32>
    %6 = vector.broadcast %5 : vector<1x128xf32> to vector<16x128xf32>
    %7 = arith.mulf %4, %6 : vector<16x128xf32>
    %8 = arith.addf %3, %7 : vector<16x128xf32>
    %c80 = arith.constant 80 : index
    %c0_3 = arith.constant 0 : index
    %9 = vector.load %arg1[%c80, %c0_3] : memref<240x128xf32, #tpu.memory_space<vmem>>, vector<16x128xf32>
    %10 = vector.extract_strided_slice %2 {offsets = [1, 0], sizes = [1, 128], strides = [1, 1]} : vector<2x128xf32> to vector<1x128xf32>
    %11 = vector.broadcast %10 : vector<1x128xf32> to vector<16x128xf32>
    %12 = arith.mulf %9, %11 : vector<16x128xf32>
    %13 = arith.addf %8, %12 : vector<16x128xf32>
    %cst = arith.constant 0.000000e+00 : f32
    %14 = vector.broadcast %cst : f32 to vector<16x128xf32>
    %15 = arith.maximumf %13, %14 : vector<16x128xf32>
    %c120 = arith.constant 120 : index
    %c0_4 = arith.constant 0 : index
    %16 = vector.load %arg1[%c120, %c0_4] : memref<240x128xf32, #tpu.memory_space<vmem>>, vector<4x16xf32>
    %17 = arith.truncf %16 : vector<4x16xf32> to vector<4x16xbf16>
    %18 = arith.truncf %15 : vector<16x128xf32> to vector<16x128xbf16>
    %cst_5 = arith.constant dense<0.000000e+00> : vector<4x128xf32>
    %19 = tpu.matmul %17, %18, %cst_5 {dimension_numbers = #tpu.dot_dimension_numbers<[1], [0], [0], [1], [0, 0, 1, 1], [], []>} : vector<4x16xbf16>, vector<16x128xbf16>, vector<4x128xf32> -> vector<4x128xf32>
    %c112 = arith.constant 112 : index
    %c0_6 = arith.constant 0 : index
    %20 = vector.load %arg1[%c112, %c0_6] : memref<240x128xf32, #tpu.memory_space<vmem>>, vector<4x128xf32>
    %21 = arith.addf %19, %20 : vector<4x128xf32>
    %22 = vector.extract_strided_slice %21 {offsets = [0, 0], sizes = [2, 128], strides = [1, 1]} : vector<4x128xf32> to vector<2x128xf32>
    %23 = vector.extract_strided_slice %21 {offsets = [2, 0], sizes = [2, 128], strides = [1, 1]} : vector<4x128xf32> to vector<2x128xf32>
    %24 = arith.subf %1, %22 : vector<2x128xf32>
    %cst_7 = arith.constant 0.000000e+00 : f32
    %25 = vector.broadcast %cst_7 : f32 to vector<2x128xf32>
    %26 = arith.subf %25, %23 : vector<2x128xf32>
    %27 = math.exp %26 : vector<2x128xf32>
    %28 = arith.mulf %24, %27 : vector<2x128xf32>
    %29 = vector.extract_strided_slice %23 {offsets = [0, 0], sizes = [1, 128], strides = [1, 1]} : vector<2x128xf32> to vector<1x128xf32>
    %30 = vector.extract_strided_slice %23 {offsets = [1, 0], sizes = [1, 128], strides = [1, 1]} : vector<2x128xf32> to vector<1x128xf32>
    %31 = arith.addf %29, %30 : vector<1x128xf32>
    %cst_8 = arith.constant 0.000000e+00 : f32
    %32 = vector.broadcast %cst_8 : f32 to vector<1x128xf32>
    %33 = arith.subf %32, %31 : vector<1x128xf32>
    %c32 = arith.constant 32 : index
    %c0_9 = arith.constant 0 : index
    %34 = vector.load %arg1[%c32, %c0_9] : memref<240x128xf32, #tpu.memory_space<vmem>>, vector<16x128xf32>
    %c0_10 = arith.constant 0 : index
    %c0_11 = arith.constant 0 : index
    %35 = vector.load %arg1[%c0_10, %c0_11] : memref<240x128xf32, #tpu.memory_space<vmem>>, vector<16x128xf32>
    %36 = vector.extract_strided_slice %28 {offsets = [0, 0], sizes = [1, 128], strides = [1, 1]} : vector<2x128xf32> to vector<1x128xf32>
    %37 = vector.broadcast %36 : vector<1x128xf32> to vector<16x128xf32>
    %38 = arith.mulf %35, %37 : vector<16x128xf32>
    %39 = arith.addf %34, %38 : vector<16x128xf32>
    %c16 = arith.constant 16 : index
    %c0_12 = arith.constant 0 : index
    %40 = vector.load %arg1[%c16, %c0_12] : memref<240x128xf32, #tpu.memory_space<vmem>>, vector<16x128xf32>
    %41 = vector.extract_strided_slice %28 {offsets = [1, 0], sizes = [1, 128], strides = [1, 1]} : vector<2x128xf32> to vector<1x128xf32>
    %42 = vector.broadcast %41 : vector<1x128xf32> to vector<16x128xf32>
    %43 = arith.mulf %40, %42 : vector<16x128xf32>
    %44 = arith.addf %39, %43 : vector<16x128xf32>
    %cst_13 = arith.constant 0.000000e+00 : f32
    %45 = vector.broadcast %cst_13 : f32 to vector<16x128xf32>
    %46 = arith.maximumf %44, %45 : vector<16x128xf32>
    %c56 = arith.constant 56 : index
    %c0_14 = arith.constant 0 : index
    %47 = vector.load %arg1[%c56, %c0_14] : memref<240x128xf32, #tpu.memory_space<vmem>>, vector<4x16xf32>
    %48 = arith.truncf %47 : vector<4x16xf32> to vector<4x16xbf16>
    %49 = arith.truncf %46 : vector<16x128xf32> to vector<16x128xbf16>
    %cst_15 = arith.constant dense<0.000000e+00> : vector<4x128xf32>
    %50 = tpu.matmul %48, %49, %cst_15 {dimension_numbers = #tpu.dot_dimension_numbers<[1], [0], [0], [1], [0, 0, 1, 1], [], []>} : vector<4x16xbf16>, vector<16x128xbf16>, vector<4x128xf32> -> vector<4x128xf32>
    %c48 = arith.constant 48 : index
    %c0_16 = arith.constant 0 : index
    %51 = vector.load %arg1[%c48, %c0_16] : memref<240x128xf32, #tpu.memory_space<vmem>>, vector<4x128xf32>
    %52 = arith.addf %50, %51 : vector<4x128xf32>
    %53 = vector.extract_strided_slice %52 {offsets = [0, 0], sizes = [2, 128], strides = [1, 1]} : vector<4x128xf32> to vector<2x128xf32>
    %54 = vector.extract_strided_slice %52 {offsets = [2, 0], sizes = [2, 128], strides = [1, 1]} : vector<4x128xf32> to vector<2x128xf32>
    %55 = arith.subf %2, %53 : vector<2x128xf32>
    %cst_17 = arith.constant 0.000000e+00 : f32
    %56 = vector.broadcast %cst_17 : f32 to vector<2x128xf32>
    %57 = arith.subf %56, %54 : vector<2x128xf32>
    %58 = math.exp %57 : vector<2x128xf32>
    %59 = arith.mulf %55, %58 : vector<2x128xf32>
    %60 = vector.extract_strided_slice %54 {offsets = [0, 0], sizes = [1, 128], strides = [1, 1]} : vector<2x128xf32> to vector<1x128xf32>
    %61 = vector.extract_strided_slice %54 {offsets = [1, 0], sizes = [1, 128], strides = [1, 1]} : vector<2x128xf32> to vector<1x128xf32>
    %62 = arith.addf %60, %61 : vector<1x128xf32>
    %cst_18 = arith.constant 0.000000e+00 : f32
    %63 = vector.broadcast %cst_18 : f32 to vector<1x128xf32>
    %64 = arith.subf %63, %62 : vector<1x128xf32>
    %65 = arith.addf %33, %64 : vector<1x128xf32>
    %c224 = arith.constant 224 : index
    %c0_19 = arith.constant 0 : index
    %66 = vector.load %arg1[%c224, %c0_19] : memref<240x128xf32, #tpu.memory_space<vmem>>, vector<8x128xf32>
    %67 = vector.extract_strided_slice %66 {offsets = [0, 0], sizes = [2, 128], strides = [1, 1]} : vector<8x128xf32> to vector<2x128xf32>
    %68 = vector.extract_strided_slice %66 {offsets = [2, 0], sizes = [2, 128], strides = [1, 1]} : vector<8x128xf32> to vector<2x128xf32>
    %69 = arith.subf %59, %67 : vector<2x128xf32>
    %70 = arith.mulf %69, %68 : vector<2x128xf32>
    %71 = vector.extract_strided_slice %70 {offsets = [0, 0], sizes = [1, 128], strides = [1, 1]} : vector<2x128xf32> to vector<1x128xf32>
    %72 = vector.extract_strided_slice %70 {offsets = [0, 0], sizes = [1, 128], strides = [1, 1]} : vector<2x128xf32> to vector<1x128xf32>
    %73 = arith.mulf %71, %72 : vector<1x128xf32>
    %74 = vector.extract_strided_slice %70 {offsets = [1, 0], sizes = [1, 128], strides = [1, 1]} : vector<2x128xf32> to vector<1x128xf32>
    %75 = vector.extract_strided_slice %70 {offsets = [1, 0], sizes = [1, 128], strides = [1, 1]} : vector<2x128xf32> to vector<1x128xf32>
    %76 = arith.mulf %74, %75 : vector<1x128xf32>
    %77 = arith.addf %73, %76 : vector<1x128xf32>
    %cst_20 = arith.constant 5.000000e-01 : f32
    %78 = vector.broadcast %cst_20 : f32 to vector<1x128xf32>
    %79 = arith.mulf %78, %77 : vector<1x128xf32>
    %80 = arith.subf %65, %79 : vector<1x128xf32>
    %81 = vector.extract_strided_slice %28 {offsets = [0, 0], sizes = [1, 128], strides = [1, 1]} : vector<2x128xf32> to vector<1x128xf32>
    %82 = vector.extract_strided_slice %28 {offsets = [1, 0], sizes = [1, 128], strides = [1, 1]} : vector<2x128xf32> to vector<1x128xf32>
    %c192 = arith.constant 192 : index
    %c0_21 = arith.constant 0 : index
    %83 = vector.load %arg1[%c192, %c0_21] : memref<240x128xf32, #tpu.memory_space<vmem>>, vector<16x128xf32>
    %c176 = arith.constant 176 : index
    %c0_22 = arith.constant 0 : index
    %84 = vector.load %arg1[%c176, %c0_22] : memref<240x128xf32, #tpu.memory_space<vmem>>, vector<16x128xf32>
    %85 = vector.broadcast %82 : vector<1x128xf32> to vector<16x128xf32>
    %86 = arith.mulf %84, %85 : vector<16x128xf32>
    %87 = arith.addf %83, %86 : vector<16x128xf32>
    %cst_23 = arith.constant 0.000000e+00 : f32
    %88 = vector.broadcast %cst_23 : f32 to vector<16x128xf32>
    %89 = arith.maximumf %87, %88 : vector<16x128xf32>
    %c216 = arith.constant 216 : index
    %c0_24 = arith.constant 0 : index
    %90 = vector.load %arg1[%c216, %c0_24] : memref<240x128xf32, #tpu.memory_space<vmem>>, vector<2x16xf32>
    %91 = arith.truncf %90 : vector<2x16xf32> to vector<2x16xbf16>
    %92 = arith.truncf %89 : vector<16x128xf32> to vector<16x128xbf16>
    %cst_25 = arith.constant dense<0.000000e+00> : vector<2x128xf32>
    %93 = tpu.matmul %91, %92, %cst_25 {dimension_numbers = #tpu.dot_dimension_numbers<[1], [0], [0], [1], [0, 0, 1, 1], [], []>} : vector<2x16xbf16>, vector<16x128xbf16>, vector<2x128xf32> -> vector<2x128xf32>
    %c208 = arith.constant 208 : index
    %c0_26 = arith.constant 0 : index
    %94 = vector.load %arg1[%c208, %c0_26] : memref<240x128xf32, #tpu.memory_space<vmem>>, vector<2x128xf32>
    %95 = arith.addf %93, %94 : vector<2x128xf32>
    %96 = vector.extract_strided_slice %95 {offsets = [0, 0], sizes = [1, 128], strides = [1, 1]} : vector<2x128xf32> to vector<1x128xf32>
    %97 = vector.extract_strided_slice %95 {offsets = [1, 0], sizes = [1, 128], strides = [1, 1]} : vector<2x128xf32> to vector<1x128xf32>
    %98 = arith.subf %81, %96 : vector<1x128xf32>
    %cst_27 = arith.constant 0.000000e+00 : f32
    %99 = vector.broadcast %cst_27 : f32 to vector<1x128xf32>
    %100 = arith.subf %99, %97 : vector<1x128xf32>
    %101 = math.exp %100 : vector<1x128xf32>
    %102 = arith.mulf %98, %101 : vector<1x128xf32>
    %cst_28 = arith.constant 0.000000e+00 : f32
    %103 = vector.broadcast %cst_28 : f32 to vector<1x128xf32>
    %104 = arith.subf %103, %97 : vector<1x128xf32>
    %c144 = arith.constant 144 : index
    %c0_29 = arith.constant 0 : index
    %105 = vector.load %arg1[%c144, %c0_29] : memref<240x128xf32, #tpu.memory_space<vmem>>, vector<16x128xf32>
    %c128 = arith.constant 128 : index
    %c0_30 = arith.constant 0 : index
    %106 = vector.load %arg1[%c128, %c0_30] : memref<240x128xf32, #tpu.memory_space<vmem>>, vector<16x128xf32>
    %107 = vector.broadcast %102 : vector<1x128xf32> to vector<16x128xf32>
    %108 = arith.mulf %106, %107 : vector<16x128xf32>
    %109 = arith.addf %105, %108 : vector<16x128xf32>
    %cst_31 = arith.constant 0.000000e+00 : f32
    %110 = vector.broadcast %cst_31 : f32 to vector<16x128xf32>
    %111 = arith.maximumf %109, %110 : vector<16x128xf32>
    %c168 = arith.constant 168 : index
    %c0_32 = arith.constant 0 : index
    %112 = vector.load %arg1[%c168, %c0_32] : memref<240x128xf32, #tpu.memory_space<vmem>>, vector<2x16xf32>
    %113 = arith.truncf %112 : vector<2x16xf32> to vector<2x16xbf16>
    %114 = arith.truncf %111 : vector<16x128xf32> to vector<16x128xbf16>
    %cst_33 = arith.constant dense<0.000000e+00> : vector<2x128xf32>
    %115 = tpu.matmul %113, %114, %cst_33 {dimension_numbers = #tpu.dot_dimension_numbers<[1], [0], [0], [1], [0, 0, 1, 1], [], []>} : vector<2x16xbf16>, vector<16x128xbf16>, vector<2x128xf32> -> vector<2x128xf32>
    %c160 = arith.constant 160 : index
    %c0_34 = arith.constant 0 : index
    %116 = vector.load %arg1[%c160, %c0_34] : memref<240x128xf32, #tpu.memory_space<vmem>>, vector<2x128xf32>
    %117 = arith.addf %115, %116 : vector<2x128xf32>
    %118 = vector.extract_strided_slice %117 {offsets = [0, 0], sizes = [1, 128], strides = [1, 1]} : vector<2x128xf32> to vector<1x128xf32>
    %119 = vector.extract_strided_slice %117 {offsets = [1, 0], sizes = [1, 128], strides = [1, 1]} : vector<2x128xf32> to vector<1x128xf32>
    %120 = arith.subf %82, %118 : vector<1x128xf32>
    %cst_35 = arith.constant 0.000000e+00 : f32
    %121 = vector.broadcast %cst_35 : f32 to vector<1x128xf32>
    %122 = arith.subf %121, %119 : vector<1x128xf32>
    %123 = math.exp %122 : vector<1x128xf32>
    %124 = arith.mulf %120, %123 : vector<1x128xf32>
    %cst_36 = arith.constant 0.000000e+00 : f32
    %125 = vector.broadcast %cst_36 : f32 to vector<1x128xf32>
    %126 = arith.subf %125, %119 : vector<1x128xf32>
    %127 = arith.addf %80, %104 : vector<1x128xf32>
    %128 = arith.addf %127, %126 : vector<1x128xf32>
    %129 = vector.extract_strided_slice %66 {offsets = [4, 0], sizes = [2, 128], strides = [1, 1]} : vector<8x128xf32> to vector<2x128xf32>
    %130 = vector.extract_strided_slice %66 {offsets = [6, 0], sizes = [2, 128], strides = [1, 1]} : vector<8x128xf32> to vector<2x128xf32>
    %131 = vector.extract_strided_slice %129 {offsets = [0, 0], sizes = [1, 128], strides = [1, 1]} : vector<2x128xf32> to vector<1x128xf32>
    %132 = arith.subf %102, %131 : vector<1x128xf32>
    %133 = vector.extract_strided_slice %130 {offsets = [0, 0], sizes = [1, 128], strides = [1, 1]} : vector<2x128xf32> to vector<1x128xf32>
    %134 = arith.mulf %132, %133 : vector<1x128xf32>
    %135 = vector.extract_strided_slice %129 {offsets = [1, 0], sizes = [1, 128], strides = [1, 1]} : vector<2x128xf32> to vector<1x128xf32>
    %136 = arith.subf %124, %135 : vector<1x128xf32>
    %137 = vector.extract_strided_slice %130 {offsets = [1, 0], sizes = [1, 128], strides = [1, 1]} : vector<2x128xf32> to vector<1x128xf32>
    %138 = arith.mulf %136, %137 : vector<1x128xf32>
    %139 = arith.mulf %134, %134 : vector<1x128xf32>
    %140 = arith.mulf %138, %138 : vector<1x128xf32>
    %141 = arith.addf %139, %140 : vector<1x128xf32>
    %cst_37 = arith.constant 5.000000e-01 : f32
    %142 = vector.broadcast %cst_37 : f32 to vector<1x128xf32>
    %143 = arith.mulf %142, %141 : vector<1x128xf32>
    %144 = arith.subf %128, %143 : vector<1x128xf32>
    %c232 = arith.constant 232 : index
    %c0_38 = arith.constant 0 : index
    %145 = vector.load %arg1[%c232, %c0_38] : memref<240x128xf32, #tpu.memory_space<vmem>>, vector<8x128xf32>
    %146 = vector.extract_strided_slice %145 {offsets = [0, 0], sizes = [1, 128], strides = [1, 1]} : vector<8x128xf32> to vector<1x128xf32>
    %147 = arith.addf %144, %146 : vector<1x128xf32>
    %148 = vector.extract_strided_slice %145 {offsets = [1, 0], sizes = [1, 128], strides = [1, 1]} : vector<8x128xf32> to vector<1x128xf32>
    %149 = arith.mulf %147, %148 : vector<1x128xf32>
    %cst_39 = arith.constant dense<0.000000e+00> : vector<1xf32>
    %150 = vector.multi_reduction <add>, %149, %cst_39 [1] : vector<1x128xf32> to vector<1xf32>
    %151 = vector.shape_cast %150 : vector<1xf32> to vector<1x1xf32>
    %152 = vector.extract_strided_slice %145 {offsets = [2, 0], sizes = [1, 128], strides = [1, 1]} : vector<8x128xf32> to vector<1x128xf32>
    %153 = arith.mulf %147, %152 : vector<1x128xf32>
    %cst_40 = arith.constant dense<0.000000e+00> : vector<1xf32>
    %154 = vector.multi_reduction <add>, %153, %cst_40 [1] : vector<1x128xf32> to vector<1xf32>
    %155 = vector.shape_cast %154 : vector<1xf32> to vector<1x1xf32>
    %156 = vector.extract_strided_slice %145 {offsets = [3, 0], sizes = [1, 128], strides = [1, 1]} : vector<8x128xf32> to vector<1x128xf32>
    %157 = vector.broadcast %151 : vector<1x1xf32> to vector<1x128xf32>
    %158 = arith.mulf %157, %156 : vector<1x128xf32>
    %159 = vector.extract_strided_slice %145 {offsets = [4, 0], sizes = [1, 128], strides = [1, 1]} : vector<8x128xf32> to vector<1x128xf32>
    %160 = vector.broadcast %155 : vector<1x1xf32> to vector<1x128xf32>
    %161 = arith.mulf %160, %159 : vector<1x128xf32>
    %162 = arith.addf %158, %161 : vector<1x128xf32>
    %cst_41 = arith.constant 0.000000e+00 : f32
    %163 = vector.broadcast %cst_41 : f32 to vector<1x128xf32>
    %164 = arith.subf %163, %162 : vector<1x128xf32>
    %c0_42 = arith.constant 0 : index
    %c0_43 = arith.constant 0 : index
    %165 = vector.load %arg2[%c0_42, %c0_43] : memref<1x128xf32, #tpu.memory_space<vmem>>, vector<1x128xf32>
    tpu.vector_store %arg2[%c0_42, %c0_43], %164 {strides = array<i32>} : memref<1x128xf32, #tpu.memory_space<vmem>>, vector<1x128xf32>,
    return
  }
}

</mosaic_0001>

<bundles_post_ra>
// kernel: multiscale_flow_forward.1
= control target key start
LH: loop header
LB: loop body
LE: loop exit
PB: predicated region body
PF: predicated region fallthrough
CT: control target
= control target key end

     0   :  { %7 = vsyncpa [#allocation3], 0  ;;  %s471_s9 = smov [#allocation2]   ;;  %s553_s0 = inlined_call_operand.vmem [shape: f32[4,128], index: 0, kind: input, shape index: {}]   ;;  %s554_s1 = inlined_call_operand.hbm [shape: f32[240,128], index: 1, kind: input, shape index: {}]   ;;  %s555_s2 = inlined_call_operand.vmem [shape: f32[1,128], index: 2, kind: output, shape index: {}]  }
   0x1   :  { %s15_s10 = sshll.u32 %s471_s9, 4  ;;  %s447_s13 = scalar_lea.hbm %s554_s1, 3840  ;;  %s16_s10 = int_to_ptr.vmem [resolvable:$true] %s15_s10 }
   0x2   :  { %p448_p0 = scmp.ne.s32.totalorder %s554_s1, %s447_s13  ;;  %p451_p1 = scmp.lt.u32.totalorder %s447_s13, %s554_s1 }
   0x4   :  { %p453_p2 = pnand %p451_p1, %p448_p0 }
   0x6   :  { %456 = shalt.err (!%p453_p2)
}
   0x7   :  { %s457_s18 = scalar_lea.vmem %s16_s10, 3840  ;;  %p462_p4 = scmp.lt.s32.totalorder %s16_s10, %s16_s10 }
   0x8   :  { %p458_p3 = scmp.ne.s32.totalorder %s16_s10, %s457_s18  ;;  %p463_p5 = scmp.lt.s32.totalorder %s457_s18, %s457_s18 }
   0xa   :  { %p464_p6 = por %p463_p5, %p462_p4 }
   0xc   :  { %p465_p7 = pnand %p464_p6, %p458_p3 }
   0xe   :  { %468 = shalt.err (!%p465_p7)
}
   0xf   :  { %s472_s19 = smov 128   ;;  %s473_s20 = smov 8  }
  0x10   :  { %21 = dma.hbm_to_vmem [thread:$0]  %s554_s1, 3840, %s16_s10, [#allocation3], %s472_s19, %s472_s19, %s473_s20  }
  0x11   :  { %469 = dma.done.wait [#allocation3], 3840  }
  0x12   :  { %470 = vsyncadd [#allocation3], 4294963456  ;;  %v31_v0 = vlaneseq  ;;  %v474_v1 = vmov 0.0   ;;  %vm475_vm0 = vmmov 0   ;;  %v516_v5 = vld [vmem:[%s553_s0] sm:$0xf] }
  0x13   :  { %410 = vmatprep.subr.bf16.mxu0 %v474_v1  ;;  %412 = vmatprep.mubr.msk.bf16.mxu0 %vm475_vm0, %v474_v1  ;;  %v29_v6 = vld [vmem:[#allocation2 + $0x40] sm:$0xff]  ;;  %v30_v7 = vld [vmem:[#allocation2 + $0x48] sm:$0xff]  ;;  %v39_v9 = vld [vmem:[#allocation2 + $0x50] sm:$0xff]  ;;  %vm55_vm1 = vcmask 130048   ;;  %vm376_vm2 = vcmask 1042434  }
  0x14   :  { %v506_v2 = vshrl.u32 %v31_v0, 7  ;;  %416 = vmatprep.subr.bf16.mxu1 %v474_v1  ;;  %418 = vmatprep.mubr.msk.bf16.mxu1 %vm475_vm0, %v474_v1  ;;  %v27_v11 = vld [vmem:[#allocation2 + $0x60] sm:$0xff]  ;;  %v28_v12 = vld [vmem:[#allocation2 + $0x68] sm:$0xff]  ;;  %v40_v13 = vld [vmem:[#allocation2 + $0x58] sm:$0xff] }
  0x15   :  { %v51_v24 = vld [vmem:[#allocation2 + $0x78] sm:$0xf]  ;;  %v54_v27 = vld [vmem:[#allocation2 + $0x70] sm:$0xf]  ;;  %v114_v43 = vld [vmem:[#allocation2] sm:$0xff] }
  0x16   :  { %v33_v3 = vsub.s32 2, %v506_v2  ;;  %v43_v4 = vsub.s32 3, %v506_v2  ;;  %v52_v26 = vpack.c.bf16 %v51_v24, %v51_v24  ;;  %v128_v38 = vsub.s32 1, %v506_v2  ;;  %v211_v41 = vld [vmem:[#allocation2 + $0xb0] sm:$0xff]  ;;  %v212_v42 = vld [vmem:[#allocation2 + $0xb8] sm:$0xff]  ;;  %v115_v44 = vld [vmem:[#allocation2 + $0x8] sm:$0xff] }
  0x17   :  { %v118_v39 = vsub.s32 0, %v506_v2  ;;  %v209_v46 = vld [vmem:[#allocation2 + $0xc0] sm:$0xff]  ;;  %v124_v48 = vld [vmem:[#allocation2 + $0x10] sm:$0xff]  ;;  %v125_v49 = vld [vmem:[#allocation2 + $0x18] sm:$0xff] }
  0x18   :  { %v34_v8 = vrot.slane %v516_v5, %v33_v3  ;;  %v44_v10 = vrot.slane %v516_v5, %v43_v4  ;;  %v210_v50 = vld [vmem:[#allocation2 + $0xc8] sm:$0xff]  ;;  %v112_v51 = vld [vmem:[#allocation2 + $0x20] sm:$0xff] }
  0x19   :  { %v113_v52 = vld [vmem:[#allocation2 + $0x28] sm:$0xff] }
  0x1a   :  { %v35_v14 = vmul.f32 %v34_v8, %v29_v6  ;;  %v36_v15 = vmul.f32 %v34_v8, %v30_v7  ;;  %v45_v16 = vmul.f32 %v44_v10, %v39_v9  ;;  %v46_v17 = vmul.f32 %v44_v10, %v40_v13  ;;  %v219_v6 = vld [vmem:[#allocation2 + $0xd8] sm:$0x3] }
  0x1b   :  { %v136_v10 = vld [vmem:[#allocation2 + $0x38] sm:$0xf] }
  0x1c   :  { %v37_v18 = vadd.f32 %v35_v14, %v27_v11  ;;  %v38_v19 = vadd.f32 %v36_v15, %v28_v12  ;;  %v220_v11 = vpack.c.bf16 %v219_v6, %v219_v6  ;;  %v137_v13 = vpack.c.bf16 %v136_v10, %v136_v10  ;;  %v222_v14 = vld [vmem:[#allocation2 + $0xd0] sm:$0x3] }
  0x1e   :  { %v47_v20 = vadd.f32 %v45_v16, %v37_v18  ;;  %v48_v21 = vadd.f32 %v46_v17, %v38_v19  ;;  %v139_v16 = vld [vmem:[#allocation2 + $0x30] sm:$0xf] }
  0x20   :  { %v49_v22 = vmax.f32 %v47_v20, 0.0  ;;  %v50_v23 = vmax.f32 %v48_v21, 0.0 }
  0x22   :  { %v53_v25 = vpack.c.bf16 %v50_v23, %v49_v22 }
  0x24   :  { %411 = vmatpush3.bf16.msra.mxu0 %v53_v25 }
  0x25   :  { %422 = vmatprep.subr.bf16.mxu0 %v474_v1 }
  0x27   :  { %413 = vmatmul.mubr.msk.bf16.vlgmr.msra.gmra.mrb[0].mxu0 %vm55_vm1, %v52_v26 }
  0x28   :  { %424 = vmatprep.mubr.msk.bf16.mxu0 %vm475_vm0, %v474_v1 }
  0xfa   :  { %v93_v28 = vpop.f32.mrb[0].mxu0 }
  0xfb   :  { %v524_v29 = vadd.f32 %v93_v28, %v54_v27  ;;  %v414_v30 = vpop.f32.mrb[1].mxu0 }
  0xfc   :  { %v96_v31 = vpop.f32.mrb[2].mxu0 }
  0xfd   :  { %v100_v32 = vsub.f32 0.0, %v524_v29  ;;  %v415_v33 = vpop.f32.mrb[3].mxu0  ;;  %v99_v36 = vsub.f32 %v516_v5, %v524_v29  ;;  %v108_v19 = vrot.slane %v524_v29, 1 }
  0xff   :  { %v101_v34 = vmul.f32 1.442695, %v100_v32  ;;  %v110_v31 = vadd.f32 %v108_v19, %v524_v29 }
 0x101   :  { %439 = vpow2.f32 %v101_v34  ;;  %v111_v34 = vsub.f32 0.0, %v110_v31  ;;  %v368_v31 = vld [vmem:[#allocation2 + $0xe8] sm:$0xff] }
 0x10b   :  { %v440_v35 = vpop.eup %439 }
 0x10c   :  { %v104_v37 = vrot.slane %v440_v35, 2 }
 0x10e   :  { %v531_v40 = vmul.f32 %v104_v37, %v99_v36 }
 0x110   :  { %v129_v45 = vrot.slane %v531_v40, %v128_v38  ;;  %v119_v47 = vrot.slane %v531_v40, %v118_v39  ;;  %v196_v38 = vld [vmem:[#allocation2 + $0xe0] sm:$0xff] }
 0x112   :  { %v213_v53 = vmul.f32 %v211_v41, %v129_v45  ;;  %v214_v54 = vmul.f32 %v212_v42, %v129_v45  ;;  %v120_v55 = vmul.f32 %v119_v47, %v114_v43  ;;  %v121_v56 = vmul.f32 %v119_v47, %v115_v44 }
 0x113   :  { %v130_v57 = vmul.f32 %v129_v45, %v124_v48  ;;  %v131_v58 = vmul.f32 %v129_v45, %v125_v49  ;;  %v198_v43 = vrot.slane %v196_v38, 6  ;;  %v276_v48 = vld [vmem:[#allocation2 + $0x80] sm:$0xff]  ;;  %v277_v49 = vld [vmem:[#allocation2 + $0x88] sm:$0xff] }
 0x114   :  { %v215_v59 = vadd.f32 %v213_v53, %v209_v46  ;;  %v216_v60 = vadd.f32 %v214_v54, %v210_v50  ;;  %v122_v61 = vadd.f32 %v120_v55, %v112_v51  ;;  %v123_v62 = vadd.f32 %v121_v56, %v113_v52  ;;  %v274_v52 = vld [vmem:[#allocation2 + $0x90] sm:$0xff]  ;;  %v275_v53 = vld [vmem:[#allocation2 + $0x98] sm:$0xff] }
 0x116   :  { %v217_v63 = vmax.f32 %v215_v59, 0.0  ;;  %v218_v0 = vmax.f32 %v216_v60, 0.0  ;;  %v132_v3 = vadd.f32 %v130_v57, %v122_v61  ;;  %v133_v4 = vadd.f32 %v131_v58, %v123_v62  ;;  %v288_v61 = vld [vmem:[#allocation2 + $0xa8] sm:$0x3] }
 0x118   :  { %v221_v7 = vpack.c.bf16 %v218_v0, %v217_v63  ;;  %v134_v8 = vmax.f32 %v132_v3, 0.0  ;;  %v135_v9 = vmax.f32 %v133_v4, 0.0  ;;  %v289_v3 = vpack.c.bf16 %v288_v61, %v288_v61 }
 0x11a   :  { %423 = vmatpush3.bf16.msra.mxu0 %v221_v7  ;;  %v138_v12 = vpack.c.bf16 %v135_v9, %v134_v8  ;;  %v291_v7 = vld [vmem:[#allocation2 + $0xa0] sm:$0x3] }
 0x11c   :  { %417 = vmatpush3.bf16.msra.mxu1 %v138_v12 }
 0x11d   :  { %425 = vmatmul.mubr.msk.bf16.vlgmr.msra.gmra.mrb[4].mxu0 %vm55_vm1, %v220_v11  ;;  %428 = vmatprep.subr.bf16.mxu1 %v474_v1 }
 0x11f   :  { %419 = vmatmul.mubr.msk.bf16.vlgmr.msra.gmra.mrb[0].mxu1 %vm55_vm1, %v137_v13 }
 0x120   :  { %430 = vmatprep.mubr.msk.bf16.mxu1 %vm475_vm0, %v474_v1 }
 0x1f0   :  { %v260_v15 = vpop.f32.mrb[4].mxu0 }
 0x1f1   :  { %v261_v17 = vadd.f32 %v260_v15, %v222_v14  ;;  %v426_v18 = vpop.f32.mrb[5].mxu0 }
 0x1f2   :  { %v177_v20 = vpop.f32.mrb[0].mxu1  ;;  %v263_v21 = vpop.f32.mrb[6].mxu0  ;;  %v351_v18 = vrot.slane %v196_v38, 4 }
 0x1f3   :  { %v267_v22 = vsub.f32 0.0, %v261_v17  ;;  %v178_v23 = vadd.f32 %v177_v20, %v139_v16  ;;  %v427_v24 = vpop.f32.mrb[7].mxu0  ;;  %v420_v25 = vpop.f32.mrb[1].mxu1  ;;  %v266_v44 = vsub.f32 %v531_v40, %v261_v17 }
 0x1f4   :  { %v180_v26 = vpop.f32.mrb[2].mxu1 }
 0x1f5   :  { %v268_v27 = vmul.f32 1.442695, %v267_v22  ;;  %v187_v28 = vsub.f32 0.0, %v178_v23  ;;  %v421_v30 = vpop.f32.mrb[3].mxu1  ;;  %v191_v1 = vrot.slane %v178_v23, 1  ;;  %v184_v36 = vrot.slane %v178_v23, 6 }
 0x1f6   :  { %v344_v2 = vrot.slane %v267_v22, 7 }
 0x1f7   :  { %441 = vpow2.f32 %v268_v27  ;;  %v188_v32 = vmul.f32 1.442695, %v187_v28  ;;  %v193_v33 = vadd.f32 %v191_v1, %v178_v23  ;;  %v186_v41 = vsub.f32 %v516_v5, %v184_v36 }
 0x1f9   :  { %443 = vpow2.f32 %v188_v32  ;;  %v194_v35 = vsub.f32 0.0, %v193_v33  ;;  %v370_v33 = vrot.slane %v368_v31, 6 }
 0x1fb   :  { %v195_v37 = vadd.f32 %v194_v35, %v111_v34  ;;  %v373_v35 = vrot.slane %v368_v31, 7 }
 0x201   :  { %v442_v42 = vpop.eup %441 }
 0x202   :  { %v271_v45 = vrot.slane %v442_v42, 1 }
 0x203   :  { %v444_v46 = vpop.eup %443 }
 0x204   :  { %v273_v47 = vmul.f32 %v271_v45, %v266_v44  ;;  %v190_v29 = vmul.f32 %v444_v46, %v186_v41  ;;  %v387_v44 = vrot.slane %v368_v31, 2 }
 0x206   :  { %v281_v50 = vrot.slane %v273_v47, %v118_v39  ;;  %v200_v51 = vsub.f32 %v190_v29, %v198_v43  ;;  %v353_v21 = vsub.f32 %v273_v47, %v351_v18 }
 0x208   :  { %v282_v54 = vmul.f32 %v281_v50, %v276_v48  ;;  %v283_v55 = vmul.f32 %v281_v50, %v277_v49  ;;  %v201_v56 = vmul.f32 %v200_v51, %v196_v38  ;;  %v354_v24 = vmul.f32 %v353_v21, %v198_v43 }
 0x20a   :  { %v284_v5 = vadd.f32 %v282_v54, %v274_v52  ;;  %v285_v57 = vadd.f32 %v283_v55, %v275_v53  ;;  %v202_v58 = vmul.f32 %v201_v56, %v201_v56  ;;  %v357_v27 = vmul.f32 %v354_v24, %v354_v24 }
 0x20c   :  { %v286_v59 = vmax.f32 %v284_v5, 0.0  ;;  %v287_v60 = vmax.f32 %v285_v57, 0.0  ;;  %v204_v62 = vrot.slane %v202_v58, 1 }
 0x20e   :  { %v290_v63 = vpack.c.bf16 %v287_v60, %v286_v59  ;;  %v206_v0 = vadd.f32 %v204_v62, %v202_v58 }
 0x210   :  { %429 = vmatpush3.bf16.msra.mxu1 %v290_v63  ;;  %v207_v4 = vmul.f32 0.5, %v206_v0 }
 0x212   :  { %v208_v39 = vsub.f32 %v195_v37, %v207_v4 }
 0x213   :  { %431 = vmatmul.mubr.msk.bf16.vlgmr.msra.gmra.mrb[4].mxu1 %vm55_vm1, %v289_v3 }
 0x214   :  { %v346_v6 = vadd.f32 %v344_v2, %v208_v39 }
 0x2e6   :  { %v329_v8 = vpop.f32.mrb[4].mxu1 }
 0x2e7   :  { %v330_v9 = vadd.f32 %v329_v8, %v291_v7  ;;  %v432_v10 = vpop.f32.mrb[5].mxu1 }
 0x2e8   :  { %v332_v11 = vpop.f32.mrb[6].mxu1 }
 0x2e9   :  { %v339_v12 = vsub.f32 0.0, %v330_v9  ;;  %v433_v13 = vpop.f32.mrb[7].mxu1  ;;  %v336_v17 = vrot.slane %v330_v9, 7 }
 0x2eb   :  { %v340_v14 = vmul.f32 1.442695, %v339_v12  ;;  %v348_v15 = vrot.slane %v339_v12, 7  ;;  %v338_v19 = vsub.f32 %v531_v40, %v336_v17 }
 0x2ed   :  { %445 = vpow2.f32 %v340_v14  ;;  %v350_v16 = vadd.f32 %v348_v15, %v346_v6 }
 0x2f7   :  { %v446_v20 = vpop.eup %445 }
 0x2f8   :  { %v342_v22 = vmul.f32 %v446_v20, %v338_v19 }
 0x2fa   :  { %v355_v23 = vsub.f32 %v342_v22, %v351_v18 }
 0x2fc   :  { %v356_v25 = vmul.f32 %v355_v23, %v198_v43  ;;  %v384_v43 = vrot.slane %v368_v31, 1 }
 0x2fe   :  { %v358_v26 = vmul.f32 %v356_v25, %v356_v25 }
 0x300   :  { %v360_v28 = vrot.slane %v358_v26, 1 }
 0x302   :  { %v362_v30 = vadd.f32 %v360_v28, %v357_v27 }
 0x304   :  { %v363_v1 = vmul.f32 0.5, %v362_v30 }
 0x306   :  { %v365_v32 = vrot.slane %v363_v1, 6 }
 0x308   :  { %v367_v34 = vsub.f32 %v350_v16, %v365_v32 }
 0x30a   :  { %v372_v36 = vadd.f32 %v370_v33, %v367_v34 }
 0x30c   :  { %v375_v37 = vmul.f32 %v373_v35, %v372_v36  ;;  %v380_v38 = vmul.f32 %v372_v36, %v368_v31 }
 0x30e   :  { %v377_v40 = vsel %vm376_vm2, %v375_v37, 0.0  ;;  %v381_v41 = vsel %vm376_vm2, %v380_v38, 0.0 }
 0x30f   :  { %378 = vadd.xlane.f32.xlu0 %v377_v40 }
 0x313   :  { %382 = vadd.xlane.f32.xlu0 %v381_v41 }
 0x39c   :  { %v379_v42 = vpop.xlane.xlu0 %378 }
 0x39d   :  { %v386_v46 = vmul.f32 %v384_v43, %v379_v42 }
 0x3a0   :  { %v383_v45 = vpop.xlane.xlu0 %382 }
 0x3a1   :  { %v389_v47 = vmul.f32 %v387_v44, %v383_v45 }
 0x3a3   :  { %v390_v29 = vadd.f32 %v389_v47, %v386_v46 }
 0x3a5   :  { %v391_v48 = vsub.f32 0.0, %v390_v29 }
 0x3a7   :  { %392 = vst [vmem:[%s555_s2 - $0x2] sm:$0x4] %v391_v48 }
 0x3a8   :  { %397 = vsyncpa [#allocation3], 1 }

</bundles_post_ra>
